<compile_context>
chip_gen: v5e
topology: v5e:2x2
jax: 0.10.0
libtpu: 0.0.40
codegen_flags: <defaults>
</compile_context>

<pallas_src>
import functools

import jax
import jax.numpy as jnp
from jax.experimental import pallas as pl
from jax.experimental.pallas import tpu as pltpu


# ----------------------------------------------------------------------------
# Helpers
# ----------------------------------------------------------------------------
def _feature_map(x):
    # elu(x) + 1  ==  where(x > 0, x + 1, exp(x))   (EUP exp, VPU select)
    return jnp.where(x > 0, x + 1.0, jnp.exp(x))


def _pick_q_tile(seq_len, target=256):
    """Largest query tile <= target that divides S and keeps (8,128) tiling."""
    if seq_len <= target:
        return seq_len
    for t in range(target, 7, -1):
        if seq_len % t == 0 and t % 8 == 0:
            return t
    return seq_len


# ----------------------------------------------------------------------------
# Kernel core (shared by masked / unmasked variants)
# ----------------------------------------------------------------------------
def _attention_tile(x_ref, wqkv_ref, wo_ref, bias, o_ref,
                    q_scr, k_scr, v_scr, *, num_heads, head_dim, q_tile):
    H, hd = num_heads, head_dim
    D = H * hd
    qi = pl.program_id(1)

    # ---- once per batch: fused QKV projection (model-dtype MXU operands,
    # f32 accumulation) + elu+1 feature map, stored head-major in VMEM scratch
    # so the per-tile hot path is purely head-batched MXU work.
    @pl.when(qi == 0)
    def _():
        qkv = jnp.dot(x_ref[...], wqkv_ref[...],
                      preferred_element_type=jnp.float32)        # (S, 3D)
        for h in range(H):  # static unroll, once per batch (not per tile)
            lo = h * hd
            q_scr[h] = _feature_map(qkv[:, lo:lo + hd]).astype(q_scr.dtype)
            k_scr[h] = _feature_map(qkv[:, D + lo:D + lo + hd]).astype(k_scr.dtype)
            v_scr[h] = qkv[:, 2 * D + lo:2 * D + lo + hd].astype(v_scr.dtype)

    # ---- per query tile: head-batched attention ----------------------------
    row0 = pl.multiple_of(qi * q_tile, q_tile)
    q_h = q_scr[:, pl.ds(row0, q_tile), :]                       # (H, Tq, hd)
    k_h = k_scr[...]                                             # (H, S,  hd)
    v_h = v_scr[...]                                             # (H, S,  hd)

    # scores (H, Tq, S): QK^T batched over heads, f32 accumulation on the MXU.
    s = jnp.einsum("hqd,hkd->hqk", q_h, k_h,
                   preferred_element_type=jnp.float32)
    if bias is not None:
        s = s + bias                                             # additive mask

    # Numerically stable softmax with normalization deferred past P@V.
    m = jnp.max(s, axis=-1, keepdims=True)
    p = jnp.exp(s - m)
    l = jnp.sum(p, axis=-1, keepdims=True)
    # TODO(synk): nn.Dropout(p=0.1) on attention weights omitted
    # (eval-mode identity; training parity needs pltpu.prng_seed/prng_random_bits).

    # Unnormalized context, then scale (Tq, hd) result by 1/l (EUP reciprocal)
    # instead of dividing the (Tq, S) probability matrix on the VPU.
    ctx = jnp.einsum("hqk,hkd->hqd", p.astype(v_h.dtype), v_h,
                     preferred_element_type=jnp.float32)         # (H, Tq, hd)
    ctx = ctx * pl.reciprocal(l, approx=True)

    # Output projection folded per head (no lane-axis concat of head contexts):
    # out = sum_h ctx[h] @ Wo[h]   with Wo pre-reshaped to (H, hd, D).
    outs = jnp.einsum("hqd,hde->hqe", ctx.astype(wo_ref.dtype), wo_ref[...],
                      preferred_element_type=jnp.float32)        # (H, Tq, D)
    o_ref[...] = jnp.sum(outs, axis=0).astype(o_ref.dtype)       # (Tq, D)


def _mlh_kernel(x_ref, wqkv_ref, wo_ref, o_ref, q_scr, k_scr, v_scr, *,
                num_heads, head_dim, q_tile):
    _attention_tile(x_ref, wqkv_ref, wo_ref, None, o_ref, q_scr, k_scr, v_scr,
                    num_heads=num_heads, head_dim=head_dim, q_tile=q_tile)


def _mlh_kernel_masked(x_ref, wqkv_ref, wo_ref, mask_ref, o_ref,
                       q_scr, k_scr, v_scr, *, num_heads, head_dim, q_tile):
    # One compare+select over (1, S) total (vs. per-head over (S, S)).
    # Large negative bias instead of -inf: identical for partially-masked rows
    # (exp underflows to 0) and avoids NaN on fully-masked rows.
    bias = jnp.where(mask_ref[...] == 0.0, -1e30, 0.0)[None]     # (1, 1, S)
    _attention_tile(x_ref, wqkv_ref, wo_ref, bias, o_ref, q_scr, k_scr, v_scr,
                    num_heads=num_heads, head_dim=head_dim, q_tile=q_tile)


# ----------------------------------------------------------------------------
# Wrapper
# ----------------------------------------------------------------------------
def mlh_attention_forward(hidden_states, wq, wk, wv, wo, attention_mask=None,
                          *, num_heads=4, q_tile=None):
    """Forward of MLHAttention.  Weights are PyTorch nn.Linear layout (out, in)."""
    B, S, D = hidden_states.shape
    head_dim = D // num_heads
    dtype = hidden_states.dtype

    if q_tile is None:
        q_tile = _pick_q_tile(S)
    assert S % q_tile == 0, "q_tile must divide the sequence length"
    nq = S // q_tile

    # Fused QKV weight (D, 3D) and head-major Wo (H, hd, D), pre-transposed so
    # the kernel only issues lane-dense x @ W matmuls with model-dtype operands.
    w_qkv = jnp.concatenate([wq.T, wk.T, wv.T], axis=1).astype(dtype)
    wo_r = wo.T.reshape(num_heads, head_dim, D).astype(dtype)

    x_spec = pl.BlockSpec((None, S, D), lambda b, qi: (b, 0, 0))
    wqkv_spec = pl.BlockSpec((D, 3 * D), lambda b, qi: (0, 0))
    wo_spec = pl.BlockSpec((num_heads, head_dim, D), lambda b, qi: (0, 0, 0))
    o_spec = pl.BlockSpec((None, q_tile, D), lambda b, qi: (b, qi, 0))

    # Head-major Q/K/V scratch (model dtype), persistent across q tiles of a
    # batch; refilled at qi == 0.
    # TODO(synk): for production D on v7x, single-buffer the weight blocks
    # (pipeline_mode=pl.Buffered(1)) to reclaim VMEM — index_map is constant.
    scratch_shapes = [pltpu.VMEM((num_heads, S, head_dim), dtype),
                      pltpu.VMEM((num_heads, S, head_dim), dtype),
                      pltpu.VMEM((num_heads, S, head_dim), dtype)]

    itemsize = jnp.dtype(dtype).itemsize
    flops = (2 * B * S * D * (3 * D)                          # fused QKV proj
             + 2 * 2 * B * num_heads * S * S * head_dim       # QK^T and P@V
             + 2 * B * S * D * D)                             # output proj
    cost = pl.CostEstimate(
        flops=int(flops),
        transcendentals=int(2 * B * S * D + B * num_heads * S * S
                            + B * num_heads * S),
        bytes_accessed=int(2 * B * S * D * itemsize + 4 * D * D * itemsize),
    )
    compiler_params = pltpu.CompilerParams(
        # q-tile axis must stay "arbitrary": it reuses the per-batch K/V
        # scratch written at qi == 0.
        dimension_semantics=("parallel", "arbitrary"))
    out_shape = jax.ShapeDtypeStruct((B, S, D), dtype)

    if attention_mask is None:
        kernel = functools.partial(_mlh_kernel, num_heads=num_heads,
                                   head_dim=head_dim, q_tile=q_tile)
        in_specs = [x_spec, wqkv_spec, wo_spec]
        args = (hidden_states, w_qkv, wo_r)
    else:
        mask3d = attention_mask.astype(jnp.float32).reshape(B, 1, S)
        mask_spec = pl.BlockSpec((None, 1, S), lambda b, qi: (b, 0, 0))
        kernel = functools.partial(_mlh_kernel_masked, num_heads=num_heads,
                                   head_dim=head_dim, q_tile=q_tile)
        in_specs = [x_spec, wqkv_spec, wo_spec, mask_spec]
        args = (hidden_states, w_qkv, wo_r, mask3d)

    return pl.pallas_call(
        kernel,
        out_shape=out_shape,
        grid_spec=pltpu.PrefetchScalarGridSpec(
            num_scalar_prefetch=0,
            grid=(B, nq),
            in_specs=in_specs,
            out_specs=o_spec,
            scratch_shapes=scratch_shapes,
        ),
        compiler_params=compiler_params,
        cost_estimate=cost,
    )(*args)


# ----------------------------------------------------------------------------
# Pure-JAX reference (matches the PyTorch module in eval mode)
# ----------------------------------------------------------------------------
def _reference(x, wq, wk, wv, wo, mask, num_heads):
    B, S, D = x.shape
    hd = D // num_heads
    q = x @ wq.T
    k = x @ wk.T
    v = x @ wv.T
    q = q.reshape(B, S, num_heads, hd).transpose(0, 2, 1, 3)
    k = k.reshape(B, S, num_heads, hd).transpose(0, 2, 1, 3)
    v = v.reshape(B, S, num_heads, hd).transpose(0, 2, 1, 3)
    q = jnp.where(q > 0, q + 1.0, jnp.exp(q))
    k = jnp.where(k > 0, k + 1.0, jnp.exp(k))
    s = jnp.einsum("bhqd,bhkd->bhqk", q, k)
    if mask is not None:
        s = jnp.where(mask[:, None, None, :] == 0, -jnp.inf, s)
    p = jax.nn.softmax(s, axis=-1)
    ctx = jnp.einsum("bhqk,bhkd->bhqd", p, v)
    ctx = ctx.transpose(0, 2, 1, 3).reshape(B, S, D)
    return ctx @ wo.T


if __name__ == "__main__":
    key = jax.random.PRNGKey(0)
    B, S, D, H = 2, 8, 32, 4
    kx, kq, kk, kv, ko = jax.random.split(key, 5)
    scale = 1.0 / jnp.sqrt(jnp.float32(D))

    x = jax.random.normal(kx, (B, S, D), dtype=jnp.float32)
    wq = jax.random.normal(kq, (D, D), dtype=jnp.float32) * scale
    wk = jax.random.normal(kk, (D, D), dtype=jnp.float32) * scale
    wv = jax.random.normal(kv, (D, D), dtype=jnp.float32) * scale
    wo = jax.random.normal(ko, (D, D), dtype=jnp.float32) * scale

    # Tolerance allows for the EUP approximate reciprocal used to normalize
    # the (deferred-normalization) softmax output.
    TOL = 1e-2

    # --- no attention mask ---------------------------------------------------
    y = jax.block_until_ready(mlh_attention_forward(x, wq, wk, wv, wo,
                                                    None, num_heads=H))
    y_ref = _reference(x, wq, wk, wv, wo, None, H)
    assert y.shape == (B, S, D) and y.dtype == x.dtype
    assert jnp.allclose(y, y_ref, rtol=TOL, atol=TOL), \
        f"max err (no mask) = {jnp.max(jnp.abs(y - y_ref))}"

    # --- with attention mask (pad out last 3 key positions of batch 1) -------
    mask = jnp.ones((B, S), dtype=jnp.float32).at[1, 5:].set(0.0)
    ym = jax.block_until_ready(mlh_attention_forward(x, wq, wk, wv, wo,
                                                     mask, num_heads=H))
    ym_ref = _reference(x, wq, wk, wv, wo, mask, H)
    assert jnp.allclose(ym, ym_ref, rtol=TOL, atol=TOL), \
        f"max err (masked) = {jnp.max(jnp.abs(ym - ym_ref))}"

    print("KERNEL_OK")
</pallas_src>

<mosaic_0001>
module attributes {stable_mosaic.version = 11 : i64} {
  func.func @_mlh_kernel(%arg0: i32, %arg1: i32, %arg2: memref<1x8x32xf32, #tpu.memory_space<vmem>>, %arg3: memref<32x96xf32, #tpu.memory_space<vmem>>, %arg4: memref<4x8x32xf32, #tpu.memory_space<vmem>>, %arg5: memref<1x8x32xf32, #tpu.memory_space<vmem>>, %arg6: memref<4x8x8xf32, #tpu.memory_space<vmem>>, %arg7: memref<4x8x8xf32, #tpu.memory_space<vmem>>, %arg8: memref<4x8x8xf32, #tpu.memory_space<vmem>>) attributes {dimension_semantics = [#tpu.dimension_semantics<parallel>, #tpu.dimension_semantics<arbitrary>], iteration_bounds = array<i64: 2, 1>, scalar_prefetch = 0 : i64, scratch_operands = 3 : i64, tpu.core_type = #tpu.core_type<tc>, window_params = [{transform_indices = @transform_0, window_bounds = array<i64: 1, 8, 32>}, {pipeline_mode = #tpu.pipeline_mode<synchronous>, transform_indices = @transform_1, window_bounds = array<i64: 32, 96>}, {pipeline_mode = #tpu.pipeline_mode<synchronous>, transform_indices = @transform_2, window_bounds = array<i64: 4, 8, 32>}, {transform_indices = @transform_3, window_bounds = array<i64: 1, 8, 32>}]} {
    %c0_i32 = arith.constant 0 : i32
    %0 = arith.cmpi eq, %arg1, %c0_i32 : i32
    %1 = arith.extui %0 : i1 to i32
    %c0_i32_0 = arith.constant 0 : i32
    %2 = arith.cmpi ne, %1, %c0_i32_0 : i32
    scf.if %2 {
      %c0_19 = arith.constant 0 : index
      %c0_20 = arith.constant 0 : index
      %c0_21 = arith.constant 0 : index
      %27 = vector.load %arg2[%c0_19, %c0_20, %c0_21] : memref<1x8x32xf32, #tpu.memory_space<vmem>>, vector<1x8x32xf32>
      %28 = vector.shape_cast %27 : vector<1x8x32xf32> to vector<8x32xf32>
      %c0_22 = arith.constant 0 : index
      %c0_23 = arith.constant 0 : index
      %29 = vector.load %arg3[%c0_22, %c0_23] : memref<32x96xf32, #tpu.memory_space<vmem>>, vector<32x96xf32>
      %cst_24 = arith.constant dense<0.000000e+00> : vector<8x96xf32>
      %30 = tpu.matmul %28, %29, %cst_24 {dimension_numbers = #tpu.dot_dimension_numbers<[1], [0], [0], [1], [0, 0, 1, 1], [], []>} : vector<8x32xf32>, vector<32x96xf32>, vector<8x96xf32> -> vector<8x96xf32>
      %31 = vector.extract_strided_slice %30 {offsets = [0, 0], sizes = [8, 8], strides = [1, 1]} : vector<8x96xf32> to vector<8x8xf32>
      %cst_25 = arith.constant 0.000000e+00 : f32
      %32 = vector.broadcast %cst_25 : f32 to vector<8x8xf32>
      %33 = arith.cmpf ogt, %31, %32 : vector<8x8xf32>
      %cst_26 = arith.constant 1.000000e+00 : f32
      %34 = vector.broadcast %cst_26 : f32 to vector<8x8xf32>
      %35 = arith.addf %31, %34 : vector<8x8xf32>
      %36 = math.exp %31 : vector<8x8xf32>
      %37 = arith.select %33, %35, %36 : vector<8x8xi1>, vector<8x8xf32>
      %c0_27 = arith.constant 0 : index
      %c0_28 = arith.constant 0 : index
      %c0_29 = arith.constant 0 : index
      %38 = vector.load %arg6[%c0_27, %c0_28, %c0_29] : memref<4x8x8xf32, #tpu.memory_space<vmem>>, vector<1x8x8xf32>
      %39 = vector.shape_cast %38 : vector<1x8x8xf32> to vector<8x8xf32>
      %40 = vector.shape_cast %37 : vector<8x8xf32> to vector<1x8x8xf32>
      tpu.vector_store %arg6[%c0_27, %c0_28, %c0_29], %40 {strides = array<i32>} : memref<4x8x8xf32, #tpu.memory_space<vmem>>, vector<1x8x8xf32>,
      %41 = vector.extract_strided_slice %30 {offsets = [0, 32], sizes = [8, 8], strides = [1, 1]} : vector<8x96xf32> to vector<8x8xf32>
      %cst_30 = arith.constant 0.000000e+00 : f32
      %42 = vector.broadcast %cst_30 : f32 to vector<8x8xf32>
      %43 = arith.cmpf ogt, %41, %42 : vector<8x8xf32>
      %cst_31 = arith.constant 1.000000e+00 : f32
      %44 = vector.broadcast %cst_31 : f32 to vector<8x8xf32>
      %45 = arith.addf %41, %44 : vector<8x8xf32>
      %46 = math.exp %41 : vector<8x8xf32>
      %47 = arith.select %43, %45, %46 : vector<8x8xi1>, vector<8x8xf32>
      %c0_32 = arith.constant 0 : index
      %c0_33 = arith.constant 0 : index
      %c0_34 = arith.constant 0 : index
      %48 = vector.load %arg7[%c0_32, %c0_33, %c0_34] : memref<4x8x8xf32, #tpu.memory_space<vmem>>, vector<1x8x8xf32>
      %49 = vector.shape_cast %48 : vector<1x8x8xf32> to vector<8x8xf32>
      %50 = vector.shape_cast %47 : vector<8x8xf32> to vector<1x8x8xf32>
      tpu.vector_store %arg7[%c0_32, %c0_33, %c0_34], %50 {strides = array<i32>} : memref<4x8x8xf32, #tpu.memory_space<vmem>>, vector<1x8x8xf32>,
      %51 = vector.extract_strided_slice %30 {offsets = [0, 64], sizes = [8, 8], strides = [1, 1]} : vector<8x96xf32> to vector<8x8xf32>
      %c0_35 = arith.constant 0 : index
      %c0_36 = arith.constant 0 : index
      %c0_37 = arith.constant 0 : index
      %52 = vector.load %arg8[%c0_35, %c0_36, %c0_37] : memref<4x8x8xf32, #tpu.memory_space<vmem>>, vector<1x8x8xf32>
      %53 = vector.shape_cast %52 : vector<1x8x8xf32> to vector<8x8xf32>
      %54 = vector.shape_cast %51 : vector<8x8xf32> to vector<1x8x8xf32>
      tpu.vector_store %arg8[%c0_35, %c0_36, %c0_37], %54 {strides = array<i32>} : memref<4x8x8xf32, #tpu.memory_space<vmem>>, vector<1x8x8xf32>,
      %55 = vector.extract_strided_slice %30 {offsets = [0, 8], sizes = [8, 8], strides = [1, 1]} : vector<8x96xf32> to vector<8x8xf32>
      %cst_38 = arith.constant 0.000000e+00 : f32
      %56 = vector.broadcast %cst_38 : f32 to vector<8x8xf32>
      %57 = arith.cmpf ogt, %55, %56 : vector<8x8xf32>
      %cst_39 = arith.constant 1.000000e+00 : f32
      %58 = vector.broadcast %cst_39 : f32 to vector<8x8xf32>
      %59 = arith.addf %55, %58 : vector<8x8xf32>
      %60 = math.exp %55 : vector<8x8xf32>
      %61 = arith.select %57, %59, %60 : vector<8x8xi1>, vector<8x8xf32>
      %c1 = arith.constant 1 : index
      %c0_40 = arith.constant 0 : index
      %c0_41 = arith.constant 0 : index
      %62 = vector.load %arg6[%c1, %c0_40, %c0_41] : memref<4x8x8xf32, #tpu.memory_space<vmem>>, vector<1x8x8xf32>
      %63 = vector.shape_cast %62 : vector<1x8x8xf32> to vector<8x8xf32>
      %64 = vector.shape_cast %61 : vector<8x8xf32> to vector<1x8x8xf32>
      tpu.vector_store %arg6[%c1, %c0_40, %c0_41], %64 {strides = array<i32>} : memref<4x8x8xf32, #tpu.memory_space<vmem>>, vector<1x8x8xf32>,
      %65 = vector.extract_strided_slice %30 {offsets = [0, 40], sizes = [8, 8], strides = [1, 1]} : vector<8x96xf32> to vector<8x8xf32>
      %cst_42 = arith.constant 0.000000e+00 : f32
      %66 = vector.broadcast %cst_42 : f32 to vector<8x8xf32>
      %67 = arith.cmpf ogt, %65, %66 : vector<8x8xf32>
      %cst_43 = arith.constant 1.000000e+00 : f32
      %68 = vector.broadcast %cst_43 : f32 to vector<8x8xf32>
      %69 = arith.addf %65, %68 : vector<8x8xf32>
      %70 = math.exp %65 : vector<8x8xf32>
      %71 = arith.select %67, %69, %70 : vector<8x8xi1>, vector<8x8xf32>
      %c1_44 = arith.constant 1 : index
      %c0_45 = arith.constant 0 : index
      %c0_46 = arith.constant 0 : index
      %72 = vector.load %arg7[%c1_44, %c0_45, %c0_46] : memref<4x8x8xf32, #tpu.memory_space<vmem>>, vector<1x8x8xf32>
      %73 = vector.shape_cast %72 : vector<1x8x8xf32> to vector<8x8xf32>
      %74 = vector.shape_cast %71 : vector<8x8xf32> to vector<1x8x8xf32>
      tpu.vector_store %arg7[%c1_44, %c0_45, %c0_46], %74 {strides = array<i32>} : memref<4x8x8xf32, #tpu.memory_space<vmem>>, vector<1x8x8xf32>,
      %75 = vector.extract_strided_slice %30 {offsets = [0, 72], sizes = [8, 8], strides = [1, 1]} : vector<8x96xf32> to vector<8x8xf32>
      %c1_47 = arith.constant 1 : index
      %c0_48 = arith.constant 0 : index
      %c0_49 = arith.constant 0 : index
      %76 = vector.load %arg8[%c1_47, %c0_48, %c0_49] : memref<4x8x8xf32, #tpu.memory_space<vmem>>, vector<1x8x8xf32>
      %77 = vector.shape_cast %76 : vector<1x8x8xf32> to vector<8x8xf32>
      %78 = vector.shape_cast %75 : vector<8x8xf32> to vector<1x8x8xf32>
      tpu.vector_store %arg8[%c1_47, %c0_48, %c0_49], %78 {strides = array<i32>} : memref<4x8x8xf32, #tpu.memory_space<vmem>>, vector<1x8x8xf32>,
      %79 = vector.extract_strided_slice %30 {offsets = [0, 16], sizes = [8, 8], strides = [1, 1]} : vector<8x96xf32> to vector<8x8xf32>
      %cst_50 = arith.constant 0.000000e+00 : f32
      %80 = vector.broadcast %cst_50 : f32 to vector<8x8xf32>
      %81 = arith.cmpf ogt, %79, %80 : vector<8x8xf32>
      %cst_51 = arith.constant 1.000000e+00 : f32
      %82 = vector.broadcast %cst_51 : f32 to vector<8x8xf32>
      %83 = arith.addf %79, %82 : vector<8x8xf32>
      %84 = math.exp %79 : vector<8x8xf32>
      %85 = arith.select %81, %83, %84 : vector<8x8xi1>, vector<8x8xf32>
      %c2 = arith.constant 2 : index
      %c0_52 = arith.constant 0 : index
      %c0_53 = arith.constant 0 : index
      %86 = vector.load %arg6[%c2, %c0_52, %c0_53] : memref<4x8x8xf32, #tpu.memory_space<vmem>>, vector<1x8x8xf32>
      %87 = vector.shape_cast %86 : vector<1x8x8xf32> to vector<8x8xf32>
      %88 = vector.shape_cast %85 : vector<8x8xf32> to vector<1x8x8xf32>
      tpu.vector_store %arg6[%c2, %c0_52, %c0_53], %88 {strides = array<i32>} : memref<4x8x8xf32, #tpu.memory_space<vmem>>, vector<1x8x8xf32>,
      %89 = vector.extract_strided_slice %30 {offsets = [0, 48], sizes = [8, 8], strides = [1, 1]} : vector<8x96xf32> to vector<8x8xf32>
      %cst_54 = arith.constant 0.000000e+00 : f32
      %90 = vector.broadcast %cst_54 : f32 to vector<8x8xf32>
      %91 = arith.cmpf ogt, %89, %90 : vector<8x8xf32>
      %cst_55 = arith.constant 1.000000e+00 : f32
      %92 = vector.broadcast %cst_55 : f32 to vector<8x8xf32>
      %93 = arith.addf %89, %92 : vector<8x8xf32>
      %94 = math.exp %89 : vector<8x8xf32>
      %95 = arith.select %91, %93, %94 : vector<8x8xi1>, vector<8x8xf32>
      %c2_56 = arith.constant 2 : index
      %c0_57 = arith.constant 0 : index
      %c0_58 = arith.constant 0 : index
      %96 = vector.load %arg7[%c2_56, %c0_57, %c0_58] : memref<4x8x8xf32, #tpu.memory_space<vmem>>, vector<1x8x8xf32>
      %97 = vector.shape_cast %96 : vector<1x8x8xf32> to vector<8x8xf32>
      %98 = vector.shape_cast %95 : vector<8x8xf32> to vector<1x8x8xf32>
      tpu.vector_store %arg7[%c2_56, %c0_57, %c0_58], %98 {strides = array<i32>} : memref<4x8x8xf32, #tpu.memory_space<vmem>>, vector<1x8x8xf32>,
      %99 = vector.extract_strided_slice %30 {offsets = [0, 80], sizes = [8, 8], strides = [1, 1]} : vector<8x96xf32> to vector<8x8xf32>
      %c2_59 = arith.constant 2 : index
      %c0_60 = arith.constant 0 : index
      %c0_61 = arith.constant 0 : index
      %100 = vector.load %arg8[%c2_59, %c0_60, %c0_61] : memref<4x8x8xf32, #tpu.memory_space<vmem>>, vector<1x8x8xf32>
      %101 = vector.shape_cast %100 : vector<1x8x8xf32> to vector<8x8xf32>
      %102 = vector.shape_cast %99 : vector<8x8xf32> to vector<1x8x8xf32>
      tpu.vector_store %arg8[%c2_59, %c0_60, %c0_61], %102 {strides = array<i32>} : memref<4x8x8xf32, #tpu.memory_space<vmem>>, vector<1x8x8xf32>,
      %103 = vector.extract_strided_slice %30 {offsets = [0, 24], sizes = [8, 8], strides = [1, 1]} : vector<8x96xf32> to vector<8x8xf32>
      %cst_62 = arith.constant 0.000000e+00 : f32
      %104 = vector.broadcast %cst_62 : f32 to vector<8x8xf32>
      %105 = arith.cmpf ogt, %103, %104 : vector<8x8xf32>
      %cst_63 = arith.constant 1.000000e+00 : f32
      %106 = vector.broadcast %cst_63 : f32 to vector<8x8xf32>
      %107 = arith.addf %103, %106 : vector<8x8xf32>
      %108 = math.exp %103 : vector<8x8xf32>
      %109 = arith.select %105, %107, %108 : vector<8x8xi1>, vector<8x8xf32>
      %c3 = arith.constant 3 : index
      %c0_64 = arith.constant 0 : index
      %c0_65 = arith.constant 0 : index
      %110 = vector.load %arg6[%c3, %c0_64, %c0_65] : memref<4x8x8xf32, #tpu.memory_space<vmem>>, vector<1x8x8xf32>
      %111 = vector.shape_cast %110 : vector<1x8x8xf32> to vector<8x8xf32>
      %112 = vector.shape_cast %109 : vector<8x8xf32> to vector<1x8x8xf32>
      tpu.vector_store %arg6[%c3, %c0_64, %c0_65], %112 {strides = array<i32>} : memref<4x8x8xf32, #tpu.memory_space<vmem>>, vector<1x8x8xf32>,
      %113 = vector.extract_strided_slice %30 {offsets = [0, 56], sizes = [8, 8], strides = [1, 1]} : vector<8x96xf32> to vector<8x8xf32>
      %cst_66 = arith.constant 0.000000e+00 : f32
      %114 = vector.broadcast %cst_66 : f32 to vector<8x8xf32>
      %115 = arith.cmpf ogt, %113, %114 : vector<8x8xf32>
      %cst_67 = arith.constant 1.000000e+00 : f32
      %116 = vector.broadcast %cst_67 : f32 to vector<8x8xf32>
      %117 = arith.addf %113, %116 : vector<8x8xf32>
      %118 = math.exp %113 : vector<8x8xf32>
      %119 = arith.select %115, %117, %118 : vector<8x8xi1>, vector<8x8xf32>
      %c3_68 = arith.constant 3 : index
      %c0_69 = arith.constant 0 : index
      %c0_70 = arith.constant 0 : index
      %120 = vector.load %arg7[%c3_68, %c0_69, %c0_70] : memref<4x8x8xf32, #tpu.memory_space<vmem>>, vector<1x8x8xf32>
      %121 = vector.shape_cast %120 : vector<1x8x8xf32> to vector<8x8xf32>
      %122 = vector.shape_cast %119 : vector<8x8xf32> to vector<1x8x8xf32>
      tpu.vector_store %arg7[%c3_68, %c0_69, %c0_70], %122 {strides = array<i32>} : memref<4x8x8xf32, #tpu.memory_space<vmem>>, vector<1x8x8xf32>,
      %123 = vector.extract_strided_slice %30 {offsets = [0, 88], sizes = [8, 8], strides = [1, 1]} : vector<8x96xf32> to vector<8x8xf32>
      %c3_71 = arith.constant 3 : index
      %c0_72 = arith.constant 0 : index
      %c0_73 = arith.constant 0 : index
      %124 = vector.load %arg8[%c3_71, %c0_72, %c0_73] : memref<4x8x8xf32, #tpu.memory_space<vmem>>, vector<1x8x8xf32>
      %125 = vector.shape_cast %124 : vector<1x8x8xf32> to vector<8x8xf32>
      %126 = vector.shape_cast %123 : vector<8x8xf32> to vector<1x8x8xf32>
      tpu.vector_store %arg8[%c3_71, %c0_72, %c0_73], %126 {strides = array<i32>} : memref<4x8x8xf32, #tpu.memory_space<vmem>>, vector<1x8x8xf32>,
    } else {
    }
    %c8_i32 = arith.constant 8 : i32
    %3 = arith.muli %arg1, %c8_i32 : i32
    %4 = tpu.assume_multiple %3, 8 : i32
    %c0 = arith.constant 0 : index
    %5 = arith.index_cast %4 : i32 to index
    %c0_1 = arith.constant 0 : index
    %6 = vector.load %arg6[%c0, %5, %c0_1] : memref<4x8x8xf32, #tpu.memory_space<vmem>>, vector<4x8x8xf32>
    %c0_2 = arith.constant 0 : index
    %c0_3 = arith.constant 0 : index
    %c0_4 = arith.constant 0 : index
    %7 = vector.load %arg7[%c0_2, %c0_3, %c0_4] : memref<4x8x8xf32, #tpu.memory_space<vmem>>, vector<4x8x8xf32>
    %c0_5 = arith.constant 0 : index
    %c0_6 = arith.constant 0 : index
    %c0_7 = arith.constant 0 : index
    %8 = vector.load %arg8[%c0_5, %c0_6, %c0_7] : memref<4x8x8xf32, #tpu.memory_space<vmem>>, vector<4x8x8xf32>
    "tpu.trace_start"() <{level = 10 : i32, message = "hqd,hkd->hqk"}> : () -> ()
    %cst = arith.constant dense<0.000000e+00> : vector<4x8x8xf32>
    %9 = tpu.matmul %6, %7, %cst {dimension_numbers = #tpu.dot_dimension_numbers<[2], [2], [1], [1], [0, 0, 0, 1, 1, 1], [0], [0]>} : vector<4x8x8xf32>, vector<4x8x8xf32>, vector<4x8x8xf32> -> vector<4x8x8xf32>
    "tpu.trace_stop"() : () -> ()
    %cst_8 = arith.constant dense<0xFF800000> : vector<4x8xf32>
    %10 = vector.multi_reduction <maximumf>, %9, %cst_8 [2] : vector<4x8x8xf32> to vector<4x8xf32>
    %11 = vector.shape_cast %10 : vector<4x8xf32> to vector<4x8x1xf32>
    %12 = vector.broadcast %11 : vector<4x8x1xf32> to vector<4x8x8xf32>
    %13 = arith.subf %9, %12 : vector<4x8x8xf32>
    %14 = math.exp %13 : vector<4x8x8xf32>
    %cst_9 = arith.constant dense<0.000000e+00> : vector<4x8xf32>
    %15 = vector.multi_reduction <add>, %14, %cst_9 [2] : vector<4x8x8xf32> to vector<4x8xf32>
    %16 = vector.shape_cast %15 : vector<4x8xf32> to vector<4x8x1xf32>
    "tpu.trace_start"() <{level = 10 : i32, message = "hqk,hkd->hqd"}> : () -> ()
    %cst_10 = arith.constant dense<0.000000e+00> : vector<4x8x8xf32>
    %17 = tpu.matmul %14, %8, %cst_10 {dimension_numbers = #tpu.dot_dimension_numbers<[2], [1], [1], [2], [0, 0, 0, 1, 1, 2], [0], [0]>} : vector<4x8x8xf32>, vector<4x8x8xf32>, vector<4x8x8xf32> -> vector<4x8x8xf32>
    "tpu.trace_stop"() : () -> ()
    %18 = tpu.reciprocal %16 {approx = true} : vector<4x8x1xf32> -> vector<4x8x1xf32>
    %19 = vector.broadcast %18 : vector<4x8x1xf32> to vector<4x8x8xf32>
    %20 = arith.mulf %17, %19 : vector<4x8x8xf32>
    %c0_11 = arith.constant 0 : index
    %c0_12 = arith.constant 0 : index
    %c0_13 = arith.constant 0 : index
    %21 = vector.load %arg4[%c0_11, %c0_12, %c0_13] : memref<4x8x32xf32, #tpu.memory_space<vmem>>, vector<4x8x32xf32>
    "tpu.trace_start"() <{level = 10 : i32, message = "hqd,hde->hqe"}> : () -> ()
    %cst_14 = arith.constant dense<0.000000e+00> : vector<4x8x32xf32>
    %22 = tpu.matmul %20, %21, %cst_14 {dimension_numbers = #tpu.dot_dimension_numbers<[2], [1], [1], [2], [0, 0, 0, 1, 1, 2], [0], [0]>} : vector<4x8x8xf32>, vector<4x8x32xf32>, vector<4x8x32xf32> -> vector<4x8x32xf32>
    "tpu.trace_stop"() : () -> ()
    %cst_15 = arith.constant dense<0.000000e+00> : vector<8x32xf32>
    %23 = vector.multi_reduction <add>, %22, %cst_15 [0] : vector<4x8x32xf32> to vector<8x32xf32>
    %c0_16 = arith.constant 0 : index
    %c0_17 = arith.constant 0 : index
    %c0_18 = arith.constant 0 : index
    %24 = vector.load %arg5[%c0_16, %c0_17, %c0_18] : memref<1x8x32xf32, #tpu.memory_space<vmem>>, vector<1x8x32xf32>
    %25 = vector.shape_cast %24 : vector<1x8x32xf32> to vector<8x32xf32>
    %26 = vector.shape_cast %23 : vector<8x32xf32> to vector<1x8x32xf32>
    tpu.vector_store %arg5[%c0_16, %c0_17, %c0_18], %26 {strides = array<i32>} : memref<1x8x32xf32, #tpu.memory_space<vmem>>, vector<1x8x32xf32>,
    return
  }
  func.func @transform_0(%arg0: i32, %arg1: i32) -> (i32, i32, i32) {
    %c0_i32 = arith.constant 0 : i32
    %c0_i32_0 = arith.constant 0 : i32
    %c0_i32_1 = arith.constant 0 : i32
    return %arg0, %c0_i32, %c0_i32_0 : i32, i32, i32
  }
  func.func @transform_1(%arg0: i32, %arg1: i32) -> (i32, i32) {
    %c0_i32 = arith.constant 0 : i32
    %c0_i32_0 = arith.constant 0 : i32
    %c0_i32_1 = arith.constant 0 : i32
    return %c0_i32, %c0_i32_0 : i32, i32
  }
  func.func @transform_2(%arg0: i32, %arg1: i32) -> (i32, i32, i32) {
    %c0_i32 = arith.constant 0 : i32
    %c0_i32_0 = arith.constant 0 : i32
    %c0_i32_1 = arith.constant 0 : i32
    %c0_i32_2 = arith.constant 0 : i32
    return %c0_i32, %c0_i32_0, %c0_i32_1 : i32, i32, i32
  }
  func.func @transform_3(%arg0: i32, %arg1: i32) -> (i32, i32, i32) {
    %c0_i32 = arith.constant 0 : i32
    %c0_i32_0 = arith.constant 0 : i32
    return %arg0, %arg1, %c0_i32 : i32, i32, i32
  }
}

</mosaic_0001>

<bundles_post_ra>
// kernel: tpu_custom_call.1
= control target key start
LH: loop header
LB: loop body
LE: loop exit
PB: predicated region body
PF: predicated region fallthrough
CT: control target
= control target key end

     0   :  { %8 = vsyncpa [#allocation6], 0  ;;  %s1367_s0 = inlined_call_operand.hbm [shape: f32[2,8,32], index: 0, kind: input, shape index: {}]   ;;  %s1368_s1 = inlined_call_operand.hbm [shape: f32[32,96], index: 1, kind: input, shape index: {}]   ;;  %s1369_s2 = inlined_call_operand.hbm [shape: f32[4,8,32], index: 2, kind: input, shape index: {}]   ;;  %s1370_s3 = inlined_call_operand.hbm [shape: f32[2,8,32], index: 3, kind: output, shape index: {}]  }
   0x1   :  { %10 = vsyncpa [#allocation6 + $0x1], 0 }
   0x2   :  { %11 = vsyncpa [#allocation9], 0 }
   0x3   :  { %12 = vsyncpa [#allocation7], 0 }
   0x4   :  { %14 = vsyncpa [#allocation7 + $0x1], 0  ;;  %s1168_s12 = smov 0   ;;  %s1170_s13 = smov 0  }
   0x5   :  { %s1172_s14 = smov 0   ;;  %s1174_s15 = smov 0  }
   0x6   :  { %s1176_s16 = smov 0   ;;  %s1178_s17 = smov 0  }
   0x7 LB: > { %s807_s18 = sadd.s32 4294967295, %s1131_s17   ;;  %p809_p0 = scmp.ge.s32.totalorder %s1131_s17, 1  ;;  %s1131_s17 = sphi %s1178_s17, %s20_s17   ;;  %s1127_s16 = sphi %s1176_s16, %s1380_s16   ;;  %s1123_s15 = sphi %s1174_s15, %s1379_s15   ;;  %s1119_s14 = sphi %s1172_s14, %s1378_s14   ;;  %s1115_s13 = sphi %s1170_s13, %s1377_s13   ;;  %s1111_s12 = sphi %s1168_s12, %s1376_s12  }
   0x8   : > { %p1202_p1 = scmp.eq.s32.totalorder %s807_s18, 0  ;;  %p133_p2 = scmp.lt.s32.totalorder %s1131_s17, 3 }
   0x9   : > { %s144_s22 = sshll.u32 %s1368_s1, 4  ;;  %s1133_s24 = smov [#allocation8]   ;;  %s145_s22 = int_to_ptr.hbm [resolvable:$true] %s144_s22 }
   0xa   : > { %p1210_p3 = pnand %p809_p0, %p133_p2  ;;  %s146_s25 = sshll.u32 %s1133_s24, 4  ;;  %s147_s25 = int_to_ptr.vmem [resolvable:$true] %s146_s25 }
   0xb   : > { %p812_p6 = scmp.ge.s32.totalorder %s1131_s17, 2  ;;  %s158_s28 = sshll.u32 %s1369_s2, 4  ;;  %s159_s28 = int_to_ptr.hbm [resolvable:$true] %s158_s28 }
   0xc   : > { %p853_p4 = pneg %p1210_p3  ;;  %s1134_s29 = smov 128  }
   0xd   : > { %s1135_s30 = smov 8   ;;  %s1136_s4 = smov [#allocation10]  }
   0xe   : > { %p854_p5 = pnand %p853_p4, %p1202_p1  ;;  %s160_s5 = sshll.u32 %s1136_s4, 4  ;;  %s161_s5 = int_to_ptr.vmem [resolvable:$true] %s160_s5 }
   0xf   : > { %s32_s6 = sadd.s32 1, %s1127_s16  ;;  %s808_s7 = sadd.s32 4294967294, %s1131_s17  }
  0x10   : > { %856 = dma.hbm_to_vmem [thread:$0]  (!%p854_p5), %s145_s22, 512, %s147_s25, [#allocation9], %s1134_s29, %s1134_s29, %s1135_s30  }
  0x11   : > { %859 = dma.hbm_to_vmem [thread:$0]  (!%p854_p5), %s159_s28, 512, %s161_s5, [#allocation9], %s1134_s29, %s1134_s29, %s1135_s30  }
  0x12   : > { %p34_p7 = scmp.ge.s32.totalorder %s32_s6, 2  ;;  %s39_s8 = sadd.s32 1, %s1119_s14 }
  0x13   : > { %p46_p8 = scmp.ne.s32.totalorder %s1119_s14, %s1115_s13  ;;  %p47_p9 = scmp.eq.s32.totalorder %s1131_s17, 0 }
  0x14   : > { %s1382_s6 = smov (%p34_p7, %s32_s6), 0  ;;  %p52_p10 = scmp.ne.s32.totalorder %s1115_s13, %s1111_s12 }
  0x15   : > { %s36_s9 = ssub.s32 %s1127_s16, %s1382_s6  ;;  %p120_p11 = scmp.eq.s32.totalorder %s807_s18, 1 }
  0x16   : > { %p37_p12 = scmp.eq.s32.totalorder %s36_s9, 0  ;;  %p1238_p13 = por %p1202_p1, %p52_p10 }
  0x17   : > { %p1242_p0 = por %p120_p11, %p46_p8  ;;  %p126_p2 = scmp.eq.s32.totalorder %s808_s7, 1 }
  0x18   : > { %s1247_s20 = scalar_select %p37_p12, %s1119_s14, %s39_s8  }
  0x19   : > { %p48_p4 = por %p47_p9, %p46_p8  ;;  %p1249_p5 = por %p126_p2, %p52_p10 }
  0x1a   : > { %s174_s22 = sand.u32 1, %s1119_s14   ;;  %s814_s18 = sshll.u32 %s1127_s16, 3 }
  0x1b   : > { %p870_p7 = scmp.lt.s32.totalorder %s1131_s17, 2  ;;  %s813_s24 = sshll.u32 %s174_s22, 3 }
  0x1c   : > { %s182_s27 = scalar_lea.hbm %s1367_s0, %s814_s18  ;;  %s178_s29 = scalar_lea.vmem [#allocation5], %s813_s24 }
  0x1d   : > { %s184_s28 = sshll.u32 %s182_s27, 4  ;;  %s186_s30 = sshll.u32 %s178_s29, 4  ;;  %s185_s28 = int_to_ptr.hbm [resolvable:$true] %s184_s28  ;;  %s187_s30 = int_to_ptr.vmem [resolvable:$true] %s186_s30 }
  0x1e   : > { %p861_p11 = pnand %p870_p7, %p48_p4  ;;  %s175_s4 = scalar_lea.sflag [#allocation6], %s174_s22 }
  0x1f   : > { %195 = sbr.rel (%p1210_p3) target bundleno = 851 (0x353), region = 32  ;;  %s1262_s5 = sand.u32 (!%p1210_p3), 1, %s1115_s13  }
  0x20   : > { %863 = dma.hbm_to_vmem [thread:$0]  (!%p861_p11), %s185_s28, 128, %s187_s30, %s175_s4  }
  0x21   : > { %s816_s7 = sshll.u32 (!%p1210_p3), %s1262_s5, 3  ;;  %s198_s8 = scalar_lea.sflag (!%p1210_p3), [#allocation6], %s1262_s5 }
  0x22   : > { %s201_s9 = scalar_lea.vmem (!%p1210_p3), [#allocation5], %s816_s7 }
  0x24   : > { %1098 = dma.done.wait (%p1238_p13), %s198_s8, 128  }
  0x25   : > { %1100 = vsyncadd (%p1238_p13), %s198_s8, 4294967168 }
  0x26   : > { %1102 = dma.done.wait (%p1202_p1), [#allocation9], 1024  }
  0x27   : > { %1104 = vsyncadd (%p1202_p1), [#allocation9], 4294966272  ;;  %v243_v0 = vld [vmem:[#allocation8 + $0x18] sm:$0xff]  ;;  %v242_v1 = vld [vmem:[#allocation8 + $0x10] sm:$0xff]  ;;  %vm244_vm0 = vcmask 261120   ;;  %vm273_vm1 = vcmask 64512  }
  0x28   : > { %260 = vmatpush.msra.mxu0 %v243_v0  ;;  %v241_v2 = vld [vmem:[#allocation8 + $0x8] sm:$0xff]  ;;  %v240_v3 = vld [vmem:[#allocation8] sm:$0xff]  ;;  %v239_v4 = vld [vmem:[%s201_s9] sm:$0xff]  ;;  %s1137_s19 = smov 112   ;;  %s1138_s23 = smov 96  }
  0x29   : > { %s1139_s10 = smov 88   ;;  %s1140_s22 = smov 72   ;;  %v585_v61 = vld [vmem:[#allocation10] sm:$0xff]  ;;  %v586_v62 = vld [vmem:[#allocation10 + $0x8] sm:$0xff]  ;;  %v587_v63 = vld [vmem:[#allocation10 + $0x10] sm:$0xff] }
  0x2a   : > { %261 = vmatpush.msra.mxu0 %v242_v1  ;;  %s1141_s18 = smov 80   ;;  %s1142_s24 = smov 120   ;;  %v588_v0 = vld [vmem:[#allocation10 + $0x18] sm:$0xff] }
  0x2b   : > { %s1143_s25 = smov 104   ;;  %s1144_s26 = smov 64  }
  0x2c   : > { %262 = vmatpush.msra.mxu0 %v241_v2  ;;  %s1145_s27 = smov 56   ;;  %s1146_s28 = smov 48  }
  0x2d   : > { %s1147_s29 = smov 40   ;;  %s838_s30 = sshll.u32 %s1123_s15, 3 }
  0x2e   : > { %263 = vmatpush.msra.mxu0 %v240_v3  ;;  %s702_s9 = scalar_lea.hbm %s1370_s3, %s838_s30 }
  0x2f   : > { %820 = vmatmul.msk.f32.vlgmr.msra.gmra.mxu0 %vm244_vm0, %v239_v4 }
  0xac   : > { %v1277_v5 = vpop.f32.mrf.mxu0 }
  0xad   : > { %v270_v6 = vmul.f32 1.442695, %v1277_v5  ;;  %v269_v7 = vadd.f32 1.0, %v1277_v5  ;;  %vm268_vm2 = vcmp.gt.f32.partialorder %v1277_v5, 0.0 }
  0xaf   : > { %937 = vpow2.f32 %v270_v6 }
  0xb5   : > { %v938_v8 = vpop.eup %937 }
  0xb6   : > { %v272_v9 = vsel %vm268_vm2, %v269_v7, %v938_v8 }
  0xb7   : > { %300 = vrot.lane.b32.xlu2 %v272_v9, %s1137_s19  ;;  %274 = vst.msk [vmem:[#allocation2] sm:$0xff] %vm273_vm1, %v272_v9  ;;  %276 = vrot.lane.b32.xlu1 %v272_v9, %s1138_s23  ;;  %s234_s19 = scalar_lea.vmem [#allocation11], %s816_s7  ;;  %s706_s23 = sshll.u32 %s702_s9, 4  ;;  %s707_s23 = int_to_ptr.hbm [resolvable:$true] %s706_s23 }
  0xb8   : > { %290 = vrot.lane.b32.xlu0 %v272_v9, %s1139_s10  ;;  %s704_s15 = sshll.u32 %s234_s19, 4  ;;  %s691_s10 = scalar_lea.sflag [#allocation7], %s1262_s5  ;;  %s705_s15 = int_to_ptr.vmem [resolvable:$true] %s704_s15 }
  0xbe   : > { %v332_v19 = vld [vmem:[#allocation2] sm:$0xff] }
  0xbf   : > { %320 = vrot.lane.b32.xlu2 %v272_v9, %s1140_s22  ;;  %305 = vrot.lane.b32.xlu1 %v272_v9, %s1141_s18  ;;  %s1059_s22 = sshra.s32 %s707_s23, 4  ;;  %s1060_s22 = int_to_ptr.hbm [resolvable:$true] %s1059_s22 }
  0xc0   : > { %285 = vrot.lane.b32.xlu0 %v272_v9, %s1142_s24  ;;  %s1061_s18 = scalar_lea.hbm %s1060_s22, 8  ;;  %p1066_p9 = scmp.lt.s32.totalorder %s1060_s22, %s1370_s3 }
  0xc1   : > { %p1062_p1 = scmp.ne.s32.totalorder %s1060_s22, %s1061_s18 }
  0xc3   : > { %p1063_p3 = pnand %p1062_p1, %p1242_p0 }
  0xc5   : > { %p1064_p8 = pneg %p1063_p3 }
  0xc8   : > { %315 = vrot.lane.b32.xlu0 %v272_v9, %s1143_s25  ;;  %s1065_s25 = scalar_lea.hbm %s1370_s3, 16 }
  0xc9   : > { %p1067_p10 = scmp.lt.s32.totalorder %s1065_s25, %s1061_s18 }
  0xcb   : > { %p1068_p12 = por %p1067_p10, %p1066_p9 }
  0xcd   : > { %p1069_p13 = pnand %p1068_p12, %p1064_p8 }
  0xd0   : > { %281 = vrot.lane.b32.xlu0 %v1277_v5, %s1144_s26 }
  0xd8   : > { %295 = vrot.lane.b32.xlu0 %v1277_v5, %s1145_s27 }
 0x111   : > { %v301_v10 = vpop.permute.xlu2 %300 }
 0x112   : > { %304 = vst.msk [vmem:[#allocation2 + $0x10] sm:$0xff] %vm273_vm1, %v301_v10 }
 0x119   : > { %v321_v11 = vpop.permute.xlu2 %320  ;;  %v334_v23 = vld [vmem:[#allocation2 + $0x10] sm:$0xff] }
 0x11a   : > { %324 = vst.msk [vmem:[#allocation3 + $0x18] sm:$0xff] %vm273_vm1, %v321_v11 }
 0x121   : > { %v339_v18 = vld [vmem:[#allocation3 + $0x18] sm:$0xff] }
 0x129   : > { %v277_v12 = vpop.permute.xlu1 %276 }
 0x12a   : > { %279 = vst.msk [vmem:[#allocation3] sm:$0xff] %vm273_vm1, %v277_v12  ;;  %v291_v13 = vpop.permute.xlu0 %290 }
 0x12b   : > { %294 = vst.msk [vmem:[#allocation3 + $0x8] sm:$0xff] %vm273_vm1, %v291_v13 }
 0x131   : > { %v306_v14 = vpop.permute.xlu1 %305  ;;  %v336_v15 = vld [vmem:[#allocation3] sm:$0xff] }
 0x132   : > { %309 = vst.msk [vmem:[#allocation3 + $0x10] sm:$0xff] %vm273_vm1, %v306_v14  ;;  %v286_v16 = vpop.permute.xlu0 %285  ;;  %821 = vmatpush.xpose.msk.msra.mxu1 %vm273_vm1, %v336_v15  ;;  %v337_v17 = vld [vmem:[#allocation3 + $0x8] sm:$0xff] }
 0x133   : > { %289 = vst.msk [vmem:[#allocation2 + $0x8] sm:$0xff] %vm273_vm1, %v286_v16  ;;  %823 = vmatpush.xpose.msk.msra.mxu2 %vm273_vm1, %v337_v17 }
 0x135   : > { %822 = vmatmul.msk.f32.vlgmr.msra.gmra.mxu1 %vm273_vm1, %v332_v19 }
 0x136   : > { %827 = vmatpush.xpose.msk.msrb.mxu1 %vm273_vm1, %v339_v18 }
 0x139   : > { %v338_v20 = vld [vmem:[#allocation3 + $0x10] sm:$0xff] }
 0x13a   : > { %v316_v21 = vpop.permute.xlu0 %315  ;;  %v333_v22 = vld [vmem:[#allocation2 + $0x8] sm:$0xff]  ;;  %825 = vmatpush.xpose.msk.msra.mxu3 %vm273_vm1, %v338_v20 }
 0x13b   : > { %319 = vst.msk [vmem:[#allocation2 + $0x18] sm:$0xff] %vm273_vm1, %v316_v21  ;;  %824 = vmatmul.msk.f32.vlgmr.msra.gmra.mxu2 %vm273_vm1, %v333_v22 }
 0x13d   : > { %826 = vmatmul.msk.f32.vlgmr.msra.gmra.mxu3 %vm273_vm1, %v334_v23 }
 0x142   : > { %v282_v24 = vpop.permute.xlu0 %281  ;;  %v335_v25 = vld [vmem:[#allocation2 + $0x18] sm:$0xff] }
 0x143   : > { %284 = vst.msk [vmem:[#allocation4] sm:$0xff] %vm273_vm1, %v282_v24  ;;  %828 = vmatmul.msk.f32.vlgmr.msrb.gmra.mxu1 %vm273_vm1, %v335_v25 }
 0x14a   : > { %v296_v26 = vpop.permute.xlu0 %295  ;;  %v340_v27 = vld [vmem:[#allocation4] sm:$0xff] }
 0x14b   : > { %299 = vst.msk [vmem:[#allocation4 + $0x8] sm:$0xff] %vm273_vm1, %v296_v26  ;;  %503 = vmatpush.msrb.mxu2 %v340_v27 }
 0x14d   : > { %607 = vmatpush.msra.mxu2 %v585_v61 }
 0x152   : > { %v341_v28 = vld [vmem:[#allocation4 + $0x8] sm:$0xff] }
 0x153   : > { %526 = vmatpush.msrb.mxu3 %v341_v28 }
 0x155   : > { %630 = vmatpush.msra.mxu3 %v586_v62 }
 0x1b2   : > { %v368_v29 = vpop.f32.mrf.mxu1 }
 0x1b3   : > { %v449_v30 = vsel %vm273_vm1, %v368_v29, -inf }
 0x1b4   : > { %450 = vmax.xlane.f32.xlu1 %v449_v30 }
 0x1be   : > { %v394_v31 = vpop.f32.mrf.mxu2 }
 0x1bf   : > { %v452_v32 = vsel %vm273_vm1, %v394_v31, -inf }
 0x1c0   : > { %453 = vmax.xlane.f32.xlu2 %v452_v32  ;;  %v420_v33 = vpop.f32.mrf.mxu3  ;;  %v446_v35 = vpop.f32.mrf.mxu1 }
 0x1c1   : > { %v455_v34 = vsel %vm273_vm1, %v420_v33, -inf  ;;  %v458_v36 = vsel %vm273_vm1, %v446_v35, -inf }
 0x1c2   : > { %456 = vmax.xlane.f32.xlu0 %v455_v34 }
 0x1c8   : > { %459 = vmax.xlane.f32.xlu2 %v458_v36 }
 0x1cd   : > { %310 = vrot.lane.b32.xlu1 %v1277_v5, %s1146_s28 }
 0x1e0   : > { %325 = vrot.lane.b32.xlu2 %v1277_v5, %s1147_s29 }
 0x227   : > { %v451_v37 = vpop.xlane.xlu1 %450 }
 0x228   : > { %v461_v38 = vsub.f32 %v368_v29, %v451_v37 }
 0x22a   : > { %v465_v39 = vmul.f32 1.442695, %v461_v38 }
 0x22c   : > { %939 = vpow2.f32 %v465_v39 }
 0x232   : > { %v940_v40 = vpop.eup %939 }
 0x233   : > { %v454_v41 = vpop.xlane.xlu2 %453  ;;  %829 = vmatmul.msk.f32.vlgmr.msrb.gmra.mxu2 %vm273_vm1, %v940_v40  ;;  %v473_v42 = vsel %vm273_vm1, %v940_v40, 0.0 }
 0x234   : > { %v462_v43 = vsub.f32 %v394_v31, %v454_v41  ;;  %474 = vadd.xlane.f32.xlu0 %v473_v42 }
 0x235   : > { %v457_v44 = vpop.xlane.xlu0 %456 }
 0x236   : > { %v467_v45 = vmul.f32 1.442695, %v462_v43  ;;  %v463_v46 = vsub.f32 %v420_v33, %v457_v44 }
 0x238   : > { %941 = vpow2.f32 %v467_v45  ;;  %v469_v47 = vmul.f32 1.442695, %v463_v46 }
 0x23a   : > { %943 = vpow2.f32 %v469_v47 }
 0x23b   : > { %v460_v48 = vpop.xlane.xlu2 %459 }
 0x23c   : > { %v464_v49 = vsub.f32 %v446_v35, %v460_v48 }
 0x23e   : > { %v942_v50 = vpop.eup %941  ;;  %v471_v51 = vmul.f32 1.442695, %v464_v49 }
 0x23f   : > { %830 = vmatmul.msk.f32.vlgmr.msrb.gmra.mxu3 %vm273_vm1, %v942_v50  ;;  %v476_v52 = vsel %vm273_vm1, %v942_v50, 0.0  ;;  %v311_v53 = vpop.permute.xlu1 %310 }
 0x240   : > { %v944_v54 = vpop.eup %943  ;;  %945 = vpow2.f32 %v471_v51  ;;  %477 = vadd.xlane.f32.xlu1 %v476_v52  ;;  %314 = vst.msk [vmem:[#allocation4 + $0x10] sm:$0xff] %vm273_vm1, %v311_v53 }
 0x241   : > { %v479_v55 = vsel %vm273_vm1, %v944_v54, 0.0 }
 0x242   : > { %480 = vadd.xlane.f32.xlu2 %v479_v55 }
 0x243   : > { %v326_v56 = vpop.permute.xlu2 %325 }
 0x244   : > { %329 = vst.msk [vmem:[#allocation4 + $0x18] sm:$0xff] %vm273_vm1, %v326_v56 }
 0x246   : > { %v946_v57 = vpop.eup %945 }
 0x247   : > { %v482_v58 = vsel %vm273_vm1, %v946_v57, 0.0  ;;  %v342_v59 = vld [vmem:[#allocation4 + $0x10] sm:$0xff] }
 0x248   : > { %483 = vadd.xlane.f32.xlu0 %v482_v58  ;;  %549 = vmatpush.msrb.mxu0 %v342_v59 }
 0x249   : > { %831 = vmatmul.msk.f32.vlgmr.msrb.gmra.mxu0 %vm273_vm1, %v944_v54 }
 0x24a   : > { %653 = vmatpush.msra.mxu0 %v587_v63 }
 0x24b   : > { %v343_v60 = vld [vmem:[#allocation4 + $0x18] sm:$0xff] }
 0x24c   : > { %572 = vmatpush.msra.mxu1 %v343_v60 }
 0x24d   : > { %832 = vmatmul.msk.f32.vlgmr.msra.gmra.mxu1 %vm273_vm1, %v946_v57 }
 0x24e   : > { %676 = vmatpush.msrb.mxu1 %v588_v0 }
 0x2a7   : > { %v475_v1 = vpop.xlane.xlu0 %474 }
 0x2a8   : > { %947 = vrcp.f32 %v475_v1 }
 0x2ae   : > { %v948_v2 = vpop.eup %947 }
 0x2b3   : > { %v478_v5 = vpop.xlane.xlu1 %477 }
 0x2b4   : > { %949 = vrcp.f32 %v478_v5 }
 0x2b5   : > { %v481_v6 = vpop.xlane.xlu2 %480 }
 0x2b6   : > { %v505_v3 = vpop.f32.mrf.mxu2  ;;  %951 = vrcp.f32 %v481_v6 }
 0x2b7   : > { %v581_v4 = vmul.f32 %v948_v2, %v505_v3 }
 0x2b9   : > { %833 = vmatmul.msk.f32.vlgmr.msra.gmra.mxu2 %vm273_vm1, %v581_v4 }
 0x2ba   : > { %v950_v8 = vpop.eup %949 }
 0x2bb   : > { %v484_v7 = vpop.xlane.xlu0 %483 }
 0x2bc   : > { %953 = vrcp.f32 %v484_v7  ;;  %v952_v11 = vpop.eup %951 }
 0x2c2   : > { %v528_v9 = vpop.f32.mrf.mxu3  ;;  %v954_v14 = vpop.eup %953 }
 0x2c3   : > { %v582_v10 = vmul.f32 %v950_v8, %v528_v9 }
 0x2c5   : > { %834 = vmatmul.msk.f32.vlgmr.msra.gmra.mxu3 %vm273_vm1, %v582_v10 }
 0x2c6   : > { %v551_v12 = vpop.f32.mrf.mxu0 }
 0x2c7   : > { %v583_v13 = vmul.f32 %v952_v11, %v551_v12 }
 0x2c9   : > { %835 = vmatmul.msk.f32.vlgmr.msra.gmra.mxu0 %vm273_vm1, %v583_v13 }
 0x2ca   : > { %v574_v15 = vpop.f32.mrf.mxu1 }
 0x2cb   : > { %v584_v16 = vmul.f32 %v954_v14, %v574_v15 }
 0x2cd   : > { %836 = vmatmul.msk.f32.vlgmr.msrb.gmra.mxu1 %vm273_vm1, %v584_v16 }
 0x33c   : > { %v609_v17 = vpop.f32.mrf.mxu2 }
 0x33d   : > { %v682_v20 = vsel %vm244_vm0, %v609_v17, 0.0 }
 0x346   : > { %v655_v18 = vpop.f32.mrf.mxu0 }
 0x347   : > { %v685_v24 = vsel %vm244_vm0, %v655_v18, 0.0 }
 0x348   : > { %v632_v19 = vpop.f32.mrf.mxu3 }
 0x349   : > { %v683_v21 = vsel %vm244_vm0, %v632_v19, 0.0 }
 0x34a   : > { %v684_v22 = vadd.f32 %v683_v21, %v682_v20  ;;  %v678_v23 = vpop.f32.mrf.mxu1 }
 0x34b   : > { %v687_v26 = vsel %vm244_vm0, %v678_v23, 0.0 }
 0x34c   : > { %v686_v25 = vadd.f32 %v685_v24, %v684_v22 }
 0x34e   : > { %v688_v27 = vadd.f32 %v687_v26, %v686_v25 }
 0x350   : > { %689 = vst.msk [vmem:[%s234_s19] sm:$0xff] %vm244_vm0, %v688_v27 }
 0x351   : > { %1072 = shalt.err (!%p1069_p13)
}
 0x352   : > { %851 = dma.vmem_to_hbm [thread:$0]  (%p1242_p0), %s705_s15, 128, %s707_s23, %s691_s10  }
 0x353 PF: > { %s718_s5 = sand.u32 1, %s1111_s12   ;;  %p865_p2 = pnand %p812_p6, %p1249_p5 }
 0x354   : > { %s719_s28 = scalar_lea.sflag [#allocation7], %s718_s5 }
 0x355   : > { %p866_p4 = pneg %p865_p2 }
 0x357   : > { %1106 = dma.done.wait (%p866_p4), %s719_s28, 128  }
 0x358   : > { %1108 = vsyncadd (%p866_p4), %s719_s28, 4294967168  ;;  %s20_s17 = sadd.s32 1, %s1131_s17   ;;  %s1376_s12 = smov %s1115_s13 }
 0x359   : > { %p17_p7 = scmp.ge.s32.totalorder %s20_s17, 4   ;;  %s1377_s13 = smov %s1119_s14 }
 0x35a   : > { %s1378_s14 = smov %s1247_s20  ;;  %s1379_s15 = smov %s1127_s16 }
 0x35b   : > { %s1380_s16 = smov %s1382_s6  ;;  %19 = sbr.rel (!%p17_p7) target bundleno = 7 (0x7), region = 99 }
 0x360   :  { %725 = vsyncpa [#allocation6], 1 }
 0x361   :  { %727 = vsyncpa [#allocation6 + $0x1], 1 }
 0x362   :  { %728 = vsyncpa [#allocation9], 1 }
 0x363   :  { %729 = vsyncpa [#allocation7], 1 }
 0x364   :  { %731 = vsyncpa [#allocation7 + $0x1], 1 }

</bundles_post_ra>
